<compile_context>
chip_gen: v7x
topology: tpu7x:2x2x1
jax: 0.10.0
libtpu: 0.0.40
codegen_flags: <defaults>
</compile_context>

<pallas_src>
import math
from functools import lru_cache

import numpy as np
import jax
import jax.numpy as jnp
from jax.experimental import pallas as pl
from jax.experimental.pallas import tpu as pltpu


# ----------------------- host-side target building (glue) ----------------------
def _iou_wh_np(anchors, w, h):
    wa = anchors[..., 0]
    ha = anchors[..., 1]
    inter = np.minimum(w, wa) * np.minimum(h, ha)
    union = w * h + wa * ha - inter
    return inter / (union + 1e-16)


def build_targets_np(pred_shapes, targets_list, anchors, strides, img_size):
    # TODO(synk): build_targets is a ragged, data-dependent scatter over the GT
    # list; it is kept on host (numpy) rather than inside the Pallas kernel.
    tps = [np.zeros(s, dtype=np.float32) for s in pred_shapes]
    num_scales = anchors.shape[0]
    for b, target in enumerate(targets_list):
        if target.size == 0:
            continue
        tboxes = target[:, 1:] * img_size
        classes = target[:, 0].astype(np.int64)
        for idx in range(tboxes.shape[0]):
            x, y, w, h = tboxes[idx]
            best_iou, best_s, best_a = 0.0, 0, 0
            for s_idx in range(num_scales):
                ious = _iou_wh_np(anchors[s_idx], w, h)
                a_idx = int(np.argmax(ious))
                if ious[a_idx] > best_iou:
                    best_iou, best_s, best_a = float(ious[a_idx]), s_idx, a_idx
            if best_iou < 0.3:
                continue
            stride = float(strides[best_s])
            grid_size = img_size // stride
            i, j = int(x // stride), int(y // stride)
            if i >= grid_size or j >= grid_size or i < 0 or j < 0:
                continue
            x_cell = x / stride - j
            y_cell = y / stride - i
            width_cell = np.log(w / anchors[best_s, best_a, 0] + 1e-16)
            height_cell = np.log(h / anchors[best_s, best_a, 1] + 1e-16)
            tps[best_s][b, best_a, j, i, 0] = x_cell
            tps[best_s][b, best_a, j, i, 1] = y_cell
            tps[best_s][b, best_a, j, i, 2] = width_cell
            tps[best_s][b, best_a, j, i, 3] = height_cell
            tps[best_s][b, best_a, j, i, 4] = 1.0
            tps[best_s][b, best_a, j, i, 5] = classes[idx]
            for o_s in range(num_scales):
                if o_s == best_s:
                    continue
                o_iou = float(_iou_wh_np(anchors[o_s], w, h).max())
                if o_iou > 0.5:
                    o_stride = float(strides[o_s])
                    o_gs = img_size // o_stride
                    oi, oj = int(x // o_stride), int(y // o_stride)
                    if 0 <= oi < o_gs and 0 <= oj < o_gs:
                        for a in range(anchors.shape[1]):
                            tps[o_s][b, a, oj, oi, 4] = -1.0
    return tps


# --------------------------------- Pallas kernel --------------------------------
_ATAN_C = (-0.3333314528, 0.1999355085, -0.1420889944, 0.1065626393,
           -0.0752896400, 0.0429096138, -0.0161657367, 0.0028662257)


def _softplus_neg_abs(x):
    # log(1 + exp(-|x|)) -- shared softplus term of BCE-with-logits.
    # (kept as log(1+exp) rather than log1p: identical EUP cost, proven lowering;
    #  the |x|>17 underflow is negligible for a summed loss.)
    return jnp.log(1.0 + jnp.exp(-jnp.abs(x)))


def _sigmoid(x):
    # sigmoid via a single EUP tanh instead of exp + divide.
    return 0.5 * (jnp.tanh(0.5 * x) + 1.0)


def _atan_pos(x):
    # arctan(x) for x >= 0: range-reduce to [0, 1] + odd minimax polynomial
    # (Abramowitz & Stegun 4.4.49, |poly err| < 2e-8).  Exact reciprocal: this
    # only runs on the pl.when-gated obj path, so accuracy is nearly free.
    # TODO(synk): Mosaic has no guaranteed lowering for atan, hence the polynomial.
    inv = 1.0 / (x + 1e-30)
    big = x > 1.0
    z = jnp.where(big, inv, x)
    z2 = z * z
    p = jnp.float32(_ATAN_C[-1])
    for c in _ATAN_C[-2::-1]:
        p = p * z2 + jnp.float32(c)
    at = z * (1.0 + z2 * p)
    return jnp.where(big, jnp.float32(math.pi / 2) - at, at)


def _make_scale_kernel(grid_h, grid_w, num_anchors, num_classes, anchors_s,
                       block_rows, n_valid):
    H, W, A, C = grid_h, grid_w, num_anchors, num_classes
    HW = H * W
    inv_hw = 1.0 / HW
    inv_w = 1.0 / W
    inv_gw = 1.0 / W
    inv_gh = 1.0 / H
    anc = [(float(anchors_s[a, 0]), float(anchors_s[a, 1])) for a in range(A)]
    TR = block_rows
    blk = TR * 128

    def kernel(pred_ref, tgt_ref, out_ref, acc_ref):
        g = pl.program_id(1)
        last_g = pl.num_programs(1) - 1

        @pl.when(g == 0)
        def _init():
            acc_ref[...] = jnp.zeros_like(acc_ref)

        # ---- flat cell index + tail-padding mask (always needed) ----
        r_iota = jax.lax.broadcasted_iota(jnp.int32, (TR, 128), 0)
        c_iota = jax.lax.broadcasted_iota(jnp.int32, (TR, 128), 1)
        n_i = g * blk + r_iota * 128 + c_iota
        valid = n_i < n_valid

        p4 = pred_ref[0, 4]
        t4 = tgt_ref[0, 4]

        # shared BCE-with-logits pieces (used by both obj and noobj paths)
        relu4 = jnp.maximum(p4, 0.0)
        sp4 = _softplus_neg_abs(p4)

        # ---- noobj path: always computed (cheap, VPU + one EUP exp/log) ----
        noobjm = jnp.logical_and(t4 == 0.0, valid)      # mask out tail padding
        acc_ref[2] += jnp.where(noobjm, relu4 + sp4, 0.0)

        # ---- obj path: gated per tile, most YOLO tiles have no positives ----
        has_obj = jnp.max(t4) > 0.5                     # one cheap reduce per tile

        @pl.when(has_obj)
        def _obj_path():
            # flat index -> (anchor, grid_y, grid_x) via exact f32 div-by-constant
            # decomposition (operands stay < 2^23, +0.5 keeps floor off boundaries).
            n_f = n_i.astype(jnp.float32)
            a_f = jnp.floor((n_f + 0.5) * inv_hw)       # anchor index
            rem = n_f - a_f * HW
            gy = jnp.floor((rem + 0.5) * inv_w)         # grid row  (j)
            gx = rem - gy * W                           # grid col  (i)

            aw = jnp.float32(anc[A - 1][0])
            ah = jnp.float32(anc[A - 1][1])
            for a in range(A - 2, -1, -1):
                sel = a_f < (a + 0.5)
                aw = jnp.where(sel, jnp.float32(anc[a][0]), aw)
                ah = jnp.where(sel, jnp.float32(anc[a][1]), ah)

            p0 = pred_ref[0, 0]
            p1 = pred_ref[0, 1]
            p2 = pred_ref[0, 2]
            p3 = pred_ref[0, 3]
            t0 = tgt_ref[0, 0]
            t1 = tgt_ref[0, 1]
            t2 = tgt_ref[0, 2]
            t3 = tgt_ref[0, 3]
            t5 = tgt_ref[0, 5]

            # ---- decode boxes (cx, cy, w, h) ----
            px = (_sigmoid(p0) + gx) * inv_gw
            py = (_sigmoid(p1) + gy) * inv_gh
            pw = jnp.exp(p2) * aw
            ph = jnp.exp(p3) * ah
            tx = (t0 + gx) * inv_gw
            ty = (t1 + gy) * inv_gh
            tw = jnp.exp(t2) * aw
            th = jnp.exp(t3) * ah

            b1x1 = px - 0.5 * pw
            b1x2 = px + 0.5 * pw
            b1y1 = py - 0.5 * ph
            b1y2 = py + 0.5 * ph
            b2x1 = tx - 0.5 * tw
            b2x2 = tx + 0.5 * tw
            b2y1 = ty - 0.5 * th
            b2y2 = ty + 0.5 * th

            iw = jnp.maximum(jnp.minimum(b1x2, b2x2) - jnp.maximum(b1x1, b2x1), 0.0)
            ih = jnp.maximum(jnp.minimum(b1y2, b2y2) - jnp.maximum(b1y1, b2y1), 0.0)
            inter = iw * ih
            union = pw * ph + 1e-16 + tw * th - inter
            iou = jnp.minimum(inter / union, 1.0)       # exact div on rare path

            # ---- CIoU (coord loss term) ----
            cd = 4.0 * ((tx - px) * (tx - px) + (ty - py) * (ty - py))
            diag = tw * tw + th * th + 1e-16
            u = cd / diag
            qa = tw / (th + 1e-16)
            qb = pw / (ph + 1e-16)
            arct = _atan_pos(qa) - _atan_pos(qb)
            v = (4.0 / math.pi ** 2) * arct * arct
            denom = jnp.maximum((1.0 - iou) + v + 1e-16, 1e-9)   # clamp near iou->1
            alpha = v / denom
            ciou = iou - u - alpha * v

            objm = t4 == 1.0
            coord_per = jnp.where(objm, -ciou, 0.0)

            # obj BCE-with-logits, reusing relu4 + sp4 from the always-on path.
            zobj = t4 * jnp.maximum(iou, 0.0)
            obj_per = jnp.where(objm, relu4 - p4 * zobj + sp4, 0.0)

            # class BCE without materializing a one-hot target:
            #   sum_c bce(x_c, onehot_c) = sum_c (relu(x_c)+softplus(-|x_c|)) - x[tcls]
            cls = pred_ref[0, 5:5 + C]                   # [C, TR, 128]
            sp_sum = jnp.sum(jnp.maximum(cls, 0.0) + _softplus_neg_abs(cls), axis=0)
            cidx = t5.astype(jnp.int32)
            ci = jax.lax.broadcasted_iota(jnp.int32, (C, TR, 128), 0)
            gathered = jnp.sum(jnp.where(ci == cidx[None], cls, 0.0), axis=0)
            cls_per = jnp.where(objm, sp_sum - gathered, 0.0)

            acc_ref[0] += coord_per
            acc_ref[1] += obj_per
            acc_ref[3] += cls_per

        # ---- finalize: cross-row (sublane) reduce TR -> 8 before writeback ----
        @pl.when(g == last_g)
        def _finalize():
            red = acc_ref[:, 0:8, :]
            for k in range(1, TR // 8):
                red = red + acc_ref[:, k * 8:(k + 1) * 8, :]
            out_ref[0] = red                             # lane-dense (4, 8, 128) store

    return kernel


# ------------------------------- wrapper / glue ---------------------------------
def _choose_block_rows(rows_needed, depth, vmem_budget_bytes=24 << 20):
    # Pick the largest (8,128)-aligned row block fitting the VMEM budget
    # (2 inputs x 2 buffers x depth rows + accumulator scratch), then minimize
    # padded rows + per-grid-step overhead (~0.35us/step, modelled as ~4 rows).
    per_row_bytes = (2 * 2 * depth + 4) * 128 * 4
    max_rows = max(8, min(512, (vmem_budget_bytes // per_row_bytes) // 8 * 8))
    best_tr, best_cost = 8, None
    for tr in range(8, max_rows + 8, 8):
        steps = -(-rows_needed // tr)
        cost = steps * tr + 4 * steps
        if best_cost is None or cost < best_cost or (cost == best_cost and tr > best_tr):
            best_tr, best_cost = tr, cost
    return best_tr


def _derive_vmem_limit(depth, block_rows):
    # Real footprint: 2 inputs x 2 pipeline buffers + accumulator scratch +
    # double-buffered (tiny) output, plus headroom for Mosaic internals.
    bytes_per_buf = depth * block_rows * 128 * 4
    footprint = 2 * 2 * bytes_per_buf
    footprint += 4 * block_rows * 128 * 4
    footprint += 2 * 4 * 8 * 128 * 4
    limit = int(footprint * 1.5) + (2 << 20)
    return int(min(max(limit, 4 << 20), 64 << 20))


def _to_channel_major_np(arr, rows_total):
    # [B, A, H, W, D] -> [B, D, rows_total, 128]  (host side, zero padded).
    B = arr.shape[0]
    D = arr.shape[-1]
    n = arr.shape[1] * arr.shape[2] * arr.shape[3]
    flat = np.transpose(arr.reshape(B, n, D), (0, 2, 1)).astype(np.float32)
    out = np.zeros((B, D, rows_total * 128), np.float32)
    out[:, :, :n] = flat
    return out.reshape(B, D, rows_total, 128)


@lru_cache(maxsize=None)
def _get_scale_fn(B, A, H, W, D, num_classes, anchors_key):
    """Build + jit-cache the per-scale (relayout -> kernel -> reduce) function."""
    anchors_s = np.asarray(anchors_key, np.float32).reshape(A, 2)
    n = A * H * W
    # Safety margin for the f32 floor-based div/mod index decomposition.
    assert n < (1 << 23) and H * W < (1 << 22), \
        "grid too large for f32 index decomposition; widen to int math"
    rows_needed = -(-n // 128)
    TR = _choose_block_rows(rows_needed, D)
    G = -(-rows_needed // TR)
    rows_total = G * TR
    n_pad = rows_total * 128
    vmem_limit = _derive_vmem_limit(D, TR)

    kernel = _make_scale_kernel(H, W, A, num_classes, anchors_s, TR, n)

    def fn(pred, tgt_cm):
        # TODO(synk): this channels-major relayout of pred is one extra HBM pass;
        # the detection head should ideally emit [B, D, N] directly.  Done inside
        # the jit so transpose+pad fuse into one XLA launch.
        pred_cm = jnp.transpose(jnp.reshape(pred.astype(jnp.float32), (B, n, D)),
                                (0, 2, 1))
        if n_pad > n:
            pred_cm = jnp.pad(pred_cm, ((0, 0), (0, 0), (0, n_pad - n)))
        pred_cm = pred_cm.reshape(B, D, rows_total, 128)

        out = pl.pallas_call(
            kernel,
            out_shape=jax.ShapeDtypeStruct((B, 4, 8, 128), jnp.float32),
            grid=(B, G),
            in_specs=[pl.BlockSpec((1, D, TR, 128), lambda b, g: (b, 0, g, 0)),
                      pl.BlockSpec((1, D, TR, 128), lambda b, g: (b, 0, g, 0))],
            out_specs=pl.BlockSpec((1, 4, 8, 128), lambda b, g: (b, 0, 0, 0)),
            scratch_shapes=[pltpu.VMEM((4, TR, 128), jnp.float32)],
            compiler_params=pltpu.CompilerParams(
                dimension_semantics=("parallel", "arbitrary"),
                vmem_limit_bytes=vmem_limit),
        )(pred_cm, tgt_cm)
        # -> (coord_sum, obj_sum, noobj_sum, cls_sum)
        return jnp.sum(out, axis=(0, 2, 3))

    return jax.jit(fn), rows_total


def yolo_loss(preds, targets_list, anchors, strides, num_classes=1, img_size=640):
    anchors = np.asarray(anchors, dtype=np.float32).reshape(len(strides), -1, 2)
    tps = build_targets_np([tuple(p.shape) for p in preds], targets_list,
                           anchors, np.asarray(strides, np.float32), img_size)
    ns = len(strides)
    lambda_coord = 0.05 * (3 / ns)
    lambda_obj = 1.0 * ((640 / 640) ** 2 * 3 / ns)
    lambda_noobj = 0.1
    lambda_cls = 0.5 * (num_classes / 80 * 3 / ns)
    balance = [4.0, 1.0, 0.4]

    total = jnp.float32(0.0)
    for i, (pred, tgt) in enumerate(zip(preds, tps)):
        B, A, H, W, D = pred.shape
        fn, rows_total = _get_scale_fn(B, A, H, W, D, num_classes,
                                       tuple(anchors[i].reshape(-1).tolist()))
        tgt_cm = jnp.asarray(_to_channel_major_np(tgt, rows_total))
        sums = fn(jnp.asarray(pred, jnp.float32), tgt_cm)
        w = np.array([lambda_coord * balance[i],
                      lambda_obj * balance[i],
                      lambda_noobj,
                      lambda_cls], np.float32)
        total = total + jnp.sum(sums * w)
    return total, tps


# --------------------------- pure numpy reference check --------------------------
def _sigmoid_np(x):
    return 1.0 / (1.0 + np.exp(-x))


def _bce_np(x, z):
    return np.maximum(x, 0.0) - x * z + np.log1p(np.exp(-np.abs(x)))


def _bbox_iou_np(box1, box2, ciou=True):
    b1x1, b1x2 = box1[:, 0] - box1[:, 2] / 2, box1[:, 0] + box1[:, 2] / 2
    b1y1, b1y2 = box1[:, 1] - box1[:, 3] / 2, box1[:, 1] + box1[:, 3] / 2
    b2x1, b2x2 = box2[:, 0] - box2[:, 2] / 2, box2[:, 0] + box2[:, 2] / 2
    b2y1, b2y2 = box2[:, 1] - box2[:, 3] / 2, box2[:, 1] + box2[:, 3] / 2
    inter = (np.clip(np.minimum(b1x2, b2x2) - np.maximum(b1x1, b2x1), 0, None)
             * np.clip(np.minimum(b1y2, b2y2) - np.maximum(b1y1, b2y1), 0, None))
    w1, h1 = b1x2 - b1x1, b1y2 - b1y1
    w2, h2 = b2x2 - b2x1, b2y2 - b2y1
    union = w1 * h1 + 1e-16 + w2 * h2 - inter
    iou = inter / union
    if ciou:
        center_d = (b2x1 + b2x2 - b1x1 - b1x2) ** 2 + (b2y1 + b2y2 - b1y1 - b1y2) ** 2
        diag_d = (b2x2 - b2x1) ** 2 + (b2y2 - b2y1) ** 2 + 1e-16
        u = center_d / diag_d
        arct = np.arctan(w2 / (h2 + 1e-16)) - np.arctan(w1 / (h1 + 1e-16))
        v = 4 / math.pi ** 2 * arct ** 2
        s = 1 - iou
        alpha = v / (s + v + 1e-16)
        return iou - u - alpha * v
    return iou


def ref_loss_np(preds, tps, anchors, strides, num_classes):
    ns = len(strides)
    lambda_coord = 0.05 * (3 / ns)
    lambda_obj = 1.0 * ((640 / 640) ** 2 * 3 / ns)
    lambda_noobj = 0.1
    lambda_cls = 0.5 * (num_classes / 80 * 3 / ns)
    balance = [4.0, 1.0, 0.4]
    total = 0.0
    for i, (pred, target) in enumerate(zip(preds, tps)):
        B, A, H, W, D = pred.shape
        N = A * H * W
        pred = pred.reshape(B, N, D).astype(np.float64)
        target = target.reshape(B, N, D).astype(np.float64)
        obj = target[..., 4] == 1
        noobj = target[..., 4] == 0
        gx = np.broadcast_to(np.tile(np.arange(W, dtype=np.float64), A * H), (B, N))
        gy = np.broadcast_to(np.tile(np.repeat(np.arange(H, dtype=np.float64), W), A), (B, N))
        aw = np.broadcast_to(np.repeat(anchors[i][:, 0].astype(np.float64), H * W), (B, N))
        ah = np.broadcast_to(np.repeat(anchors[i][:, 1].astype(np.float64), H * W), (B, N))
        pb = np.stack([(_sigmoid_np(pred[..., 0]) + gx) / W,
                       (_sigmoid_np(pred[..., 1]) + gy) / H,
                       np.exp(pred[..., 2]) * aw,
                       np.exp(pred[..., 3]) * ah], axis=-1)
        tb = np.stack([(target[..., 0] + gx) / W,
                       (target[..., 1] + gy) / H,
                       np.exp(target[..., 2]) * aw,
                       np.exp(target[..., 3]) * ah], axis=-1)
        pbm, tbm = pb[obj], tb[obj]
        if pbm.size > 0:
            coord = (-_bbox_iou_np(pbm, tbm, ciou=True)).sum()
            iou = np.clip(_bbox_iou_np(pbm, tbm, ciou=False), 0, None)
            obj_l = _bce_np(pred[..., 4][obj], target[..., 4][obj] * iou).sum()
            cls_pred = pred[..., 5:][obj].reshape(-1, num_classes)
            tcls = np.zeros_like(cls_pred)
            tcls[np.arange(tcls.shape[0]), target[..., 5][obj].astype(np.int64)] = 1.0
            cls_l = _bce_np(cls_pred, tcls).sum()
        else:
            coord = obj_l = cls_l = 0.0
        noobj_l = _bce_np(pred[..., 4][noobj], target[..., 4][noobj]).sum()
        total += (coord * lambda_coord * balance[i] + obj_l * lambda_obj * balance[i]
                  + noobj_l * lambda_noobj + cls_l * lambda_cls)
    return total


# ------------------------------------- main --------------------------------------
if __name__ == "__main__":
    key = jax.random.PRNGKey(0)
    B, A, num_classes = 2, 3, 1
    D = 5 + num_classes
    strides = [8, 16, 32]
    img_size = 64

    # deterministic anchor parameters (module __init__ would store these)
    anchors = np.array([[4, 6], [7, 9], [11, 13],
                        [14, 18], [20, 24], [26, 32],
                        [30, 38], [40, 48], [52, 60]], dtype=np.float32).reshape(3, 3, 2)

    preds = []
    for s in strides:
        g = img_size // s
        key, sub = jax.random.split(key)
        preds.append(jax.random.normal(sub, (B, A, g, g, D), dtype=jnp.float32) * 0.5)

    # ground-truth boxes: [class, cx, cy, w, h], normalized coordinates
    targets = [
        np.array([[0, 0.50, 0.50, 0.20, 0.30],
                  [0, 0.25, 0.30, 0.50, 0.60]], dtype=np.float32),
        np.array([[0, 0.70, 0.60, 0.15, 0.10]], dtype=np.float32),
    ]

    total, tps = yolo_loss(preds, targets, anchors, strides,
                           num_classes=num_classes, img_size=img_size)
    total = jax.block_until_ready(total)

    ref = ref_loss_np([np.asarray(p) for p in preds], tps, anchors, strides, num_classes)
    assert np.isfinite(float(total))
    np.testing.assert_allclose(float(total), float(ref), rtol=5e-3, atol=1e-2)
    print("KERNEL_OK")
</pallas_src>

<mosaic_0001>
module attributes {stable_mosaic.version = 11 : i64} {
  func.func @kernel(%arg0: i32, %arg1: i32, %arg2: memref<1x6x8x128xf32, #tpu.memory_space<vmem>>, %arg3: memref<1x6x8x128xf32, #tpu.memory_space<vmem>>, %arg4: memref<1x4x8x128xf32, #tpu.memory_space<vmem>>, %arg5: memref<4x8x128xf32, #tpu.memory_space<vmem>>) attributes {dimension_semantics = [#tpu.dimension_semantics<parallel>, #tpu.dimension_semantics<arbitrary>], iteration_bounds = array<i64: 2, 1>, scalar_prefetch = 0 : i64, scratch_operands = 1 : i64, tpu.core_type = #tpu.core_type<tc>, window_params = [{transform_indices = @transform_0, window_bounds = array<i64: 1, 6, 8, 128>}, {transform_indices = @transform_1, window_bounds = array<i64: 1, 6, 8, 128>}, {transform_indices = @transform_2, window_bounds = array<i64: 1, 4, 8, 128>}]} {
    %c0_i32 = arith.constant 0 : i32
    %0 = arith.cmpi eq, %arg1, %c0_i32 : i32
    %1 = arith.extui %0 : i1 to i32
    %c0_i32_0 = arith.constant 0 : i32
    %2 = arith.cmpi ne, %1, %c0_i32_0 : i32
    scf.if %2 {
      %cst_21 = arith.constant 0.000000e+00 : f32
      %48 = vector.broadcast %cst_21 : f32 to vector<4x8x128xf32>
      %c0_22 = arith.constant 0 : index
      %c0_23 = arith.constant 0 : index
      %c0_24 = arith.constant 0 : index
      %49 = vector.load %arg5[%c0_22, %c0_23, %c0_24] : memref<4x8x128xf32, #tpu.memory_space<vmem>>, vector<4x8x128xf32>
      tpu.vector_store %arg5[%c0_22, %c0_23, %c0_24], %48 {strides = array<i32>} : memref<4x8x128xf32, #tpu.memory_space<vmem>>, vector<4x8x128xf32>,
    } else {
    }
    %3 = tpu.iota {dimensions = array<i32: 0>} : vector<8x128xi32>
    %4 = tpu.iota {dimensions = array<i32: 1>} : vector<8x128xi32>
    %c1024_i32 = arith.constant 1024 : i32
    %5 = arith.muli %arg1, %c1024_i32 : i32
    %c128_i32 = arith.constant 128 : i32
    %6 = vector.broadcast %c128_i32 : i32 to vector<8x128xi32>
    %7 = arith.muli %3, %6 : vector<8x128xi32>
    %8 = vector.broadcast %5 : i32 to vector<8x128xi32>
    %9 = arith.addi %8, %7 : vector<8x128xi32>
    %10 = arith.addi %9, %4 : vector<8x128xi32>
    %c192_i32 = arith.constant 192 : i32
    %11 = vector.broadcast %c192_i32 : i32 to vector<8x128xi32>
    %12 = arith.cmpi slt, %10, %11 : vector<8x128xi32>
    %c0 = arith.constant 0 : index
    %c4 = arith.constant 4 : index
    %c0_1 = arith.constant 0 : index
    %c0_2 = arith.constant 0 : index
    %13 = vector.load %arg2[%c0, %c4, %c0_1, %c0_2] : memref<1x6x8x128xf32, #tpu.memory_space<vmem>>, vector<1x1x8x128xf32>
    %14 = vector.shape_cast %13 : vector<1x1x8x128xf32> to vector<8x128xf32>
    %c0_3 = arith.constant 0 : index
    %c4_4 = arith.constant 4 : index
    %c0_5 = arith.constant 0 : index
    %c0_6 = arith.constant 0 : index
    %15 = vector.load %arg3[%c0_3, %c4_4, %c0_5, %c0_6] : memref<1x6x8x128xf32, #tpu.memory_space<vmem>>, vector<1x1x8x128xf32>
    %16 = vector.shape_cast %15 : vector<1x1x8x128xf32> to vector<8x128xf32>
    %cst = arith.constant 0.000000e+00 : f32
    %17 = vector.broadcast %cst : f32 to vector<8x128xf32>
    %18 = arith.maximumf %14, %17 : vector<8x128xf32>
    %19 = math.absf %14 : vector<8x128xf32>
    %cst_7 = arith.constant 0.000000e+00 : f32
    %20 = vector.broadcast %cst_7 : f32 to vector<8x128xf32>
    %21 = arith.subf %20, %19 : vector<8x128xf32>
    %22 = math.exp %21 : vector<8x128xf32>
    %cst_8 = arith.constant 1.000000e+00 : f32
    %23 = vector.broadcast %cst_8 : f32 to vector<8x128xf32>
    %24 = arith.addf %23, %22 : vector<8x128xf32>
    %25 = math.log %24 : vector<8x128xf32>
    %cst_9 = arith.constant 0.000000e+00 : f32
    %26 = vector.broadcast %cst_9 : f32 to vector<8x128xf32>
    %27 = arith.cmpf oeq, %16, %26 : vector<8x128xf32>
    %28 = arith.andi %27, %12 : vector<8x128xi1>
    %c2 = arith.constant 2 : index
    %c0_10 = arith.constant 0 : index
    %c0_11 = arith.constant 0 : index
    %29 = vector.load %arg5[%c2, %c0_10, %c0_11] : memref<4x8x128xf32, #tpu.memory_space<vmem>>, vector<1x8x128xf32>
    %30 = vector.shape_cast %29 : vector<1x8x128xf32> to vector<8x128xf32>
    %31 = arith.addf %18, %25 : vector<8x128xf32>
    %cst_12 = arith.constant 0.000000e+00 : f32
    %32 = vector.broadcast %cst_12 : f32 to vector<8x128xf32>
    %33 = arith.select %28, %31, %32 : vector<8x128xi1>, vector<8x128xf32>
    %34 = arith.addf %30, %33 : vector<8x128xf32>
    %c2_13 = arith.constant 2 : index
    %c0_14 = arith.constant 0 : index
    %c0_15 = arith.constant 0 : index
    %35 = vector.load %arg5[%c2_13, %c0_14, %c0_15] : memref<4x8x128xf32, #tpu.memory_space<vmem>>, vector<1x8x128xf32>
    %36 = vector.shape_cast %35 : vector<1x8x128xf32> to vector<8x128xf32>
    %37 = vector.shape_cast %34 : vector<8x128xf32> to vector<1x8x128xf32>
    tpu.vector_store %arg5[%c2_13, %c0_14, %c0_15], %37 {strides = array<i32>} : memref<4x8x128xf32, #tpu.memory_space<vmem>>, vector<1x8x128xf32>,
    %38 = vector.shape_cast %16 : vector<8x128xf32> to vector<1x8x128xf32>
    %cst_16 = arith.constant dense<0xFF800000> : vector<1xf32>
    %39 = vector.multi_reduction <maximumf>, %38, %cst_16 [1, 2] : vector<1x8x128xf32> to vector<1xf32>
    %40 = vector.shape_cast %39 : vector<1xf32> to vector<1x1x1xf32>
    %41 = vector.extract %40[0, 0, 0] : f32 from vector<1x1x1xf32>
    %cst_17 = arith.constant 5.000000e-01 : f32
    %42 = arith.cmpf ogt, %41, %cst_17 : f32
    %43 = arith.extui %42 : i1 to i32
    %c0_i32_18 = arith.constant 0 : i32
    %44 = arith.cmpi ne, %43, %c0_i32_18 : i32
    scf.if %44 {
      %48 = arith.sitofp %10 : vector<8x128xi32> to vector<8x128xf32>
      %cst_21 = arith.constant 5.000000e-01 : f32
      %49 = vector.broadcast %cst_21 : f32 to vector<8x128xf32>
      %50 = arith.addf %48, %49 : vector<8x128xf32>
      %cst_22 = arith.constant 1.562500e-02 : f32
      %51 = vector.broadcast %cst_22 : f32 to vector<8x128xf32>
      %52 = arith.mulf %50, %51 : vector<8x128xf32>
      %53 = math.floor %52 : vector<8x128xf32>
      %cst_23 = arith.constant 6.400000e+01 : f32
      %54 = vector.broadcast %cst_23 : f32 to vector<8x128xf32>
      %55 = arith.mulf %53, %54 : vector<8x128xf32>
      %56 = arith.subf %48, %55 : vector<8x128xf32>
      %cst_24 = arith.constant 5.000000e-01 : f32
      %57 = vector.broadcast %cst_24 : f32 to vector<8x128xf32>
      %58 = arith.addf %56, %57 : vector<8x128xf32>
      %cst_25 = arith.constant 1.250000e-01 : f32
      %59 = vector.broadcast %cst_25 : f32 to vector<8x128xf32>
      %60 = arith.mulf %58, %59 : vector<8x128xf32>
      %61 = math.floor %60 : vector<8x128xf32>
      %cst_26 = arith.constant 8.000000e+00 : f32
      %62 = vector.broadcast %cst_26 : f32 to vector<8x128xf32>
      %63 = arith.mulf %61, %62 : vector<8x128xf32>
      %64 = arith.subf %56, %63 : vector<8x128xf32>
      %cst_27 = arith.constant 1.500000e+00 : f32
      %65 = vector.broadcast %cst_27 : f32 to vector<8x128xf32>
      %66 = arith.cmpf olt, %53, %65 : vector<8x128xf32>
      %cst_28 = arith.constant 7.000000e+00 : f32
      %cst_29 = arith.constant 1.100000e+01 : f32
      %67 = vector.broadcast %cst_28 : f32 to vector<8x128xf32>
      %68 = vector.broadcast %cst_29 : f32 to vector<8x128xf32>
      %69 = arith.select %66, %67, %68 : vector<8x128xi1>, vector<8x128xf32>
      %cst_30 = arith.constant 9.000000e+00 : f32
      %cst_31 = arith.constant 1.300000e+01 : f32
      %70 = vector.broadcast %cst_30 : f32 to vector<8x128xf32>
      %71 = vector.broadcast %cst_31 : f32 to vector<8x128xf32>
      %72 = arith.select %66, %70, %71 : vector<8x128xi1>, vector<8x128xf32>
      %cst_32 = arith.constant 5.000000e-01 : f32
      %73 = vector.broadcast %cst_32 : f32 to vector<8x128xf32>
      %74 = arith.cmpf olt, %53, %73 : vector<8x128xf32>
      %cst_33 = arith.constant 4.000000e+00 : f32
      %75 = vector.broadcast %cst_33 : f32 to vector<8x128xf32>
      %76 = arith.select %74, %75, %69 : vector<8x128xi1>, vector<8x128xf32>
      %cst_34 = arith.constant 6.000000e+00 : f32
      %77 = vector.broadcast %cst_34 : f32 to vector<8x128xf32>
      %78 = arith.select %74, %77, %72 : vector<8x128xi1>, vector<8x128xf32>
      %c0_35 = arith.constant 0 : index
      %c0_36 = arith.constant 0 : index
      %c0_37 = arith.constant 0 : index
      %c0_38 = arith.constant 0 : index
      %79 = vector.load %arg2[%c0_35, %c0_36, %c0_37, %c0_38] : memref<1x6x8x128xf32, #tpu.memory_space<vmem>>, vector<1x1x8x128xf32>
      %80 = vector.shape_cast %79 : vector<1x1x8x128xf32> to vector<8x128xf32>
      %c0_39 = arith.constant 0 : index
      %c1 = arith.constant 1 : index
      %c0_40 = arith.constant 0 : index
      %c0_41 = arith.constant 0 : index
      %81 = vector.load %arg2[%c0_39, %c1, %c0_40, %c0_41] : memref<1x6x8x128xf32, #tpu.memory_space<vmem>>, vector<1x1x8x128xf32>
      %82 = vector.shape_cast %81 : vector<1x1x8x128xf32> to vector<8x128xf32>
      %c0_42 = arith.constant 0 : index
      %c2_43 = arith.constant 2 : index
      %c0_44 = arith.constant 0 : index
      %c0_45 = arith.constant 0 : index
      %83 = vector.load %arg2[%c0_42, %c2_43, %c0_44, %c0_45] : memref<1x6x8x128xf32, #tpu.memory_space<vmem>>, vector<1x1x8x128xf32>
      %84 = vector.shape_cast %83 : vector<1x1x8x128xf32> to vector<8x128xf32>
      %c0_46 = arith.constant 0 : index
      %c3 = arith.constant 3 : index
      %c0_47 = arith.constant 0 : index
      %c0_48 = arith.constant 0 : index
      %85 = vector.load %arg2[%c0_46, %c3, %c0_47, %c0_48] : memref<1x6x8x128xf32, #tpu.memory_space<vmem>>, vector<1x1x8x128xf32>
      %86 = vector.shape_cast %85 : vector<1x1x8x128xf32> to vector<8x128xf32>
      %c0_49 = arith.constant 0 : index
      %c0_50 = arith.constant 0 : index
      %c0_51 = arith.constant 0 : index
      %c0_52 = arith.constant 0 : index
      %87 = vector.load %arg3[%c0_49, %c0_50, %c0_51, %c0_52] : memref<1x6x8x128xf32, #tpu.memory_space<vmem>>, vector<1x1x8x128xf32>
      %88 = vector.shape_cast %87 : vector<1x1x8x128xf32> to vector<8x128xf32>
      %c0_53 = arith.constant 0 : index
      %c1_54 = arith.constant 1 : index
      %c0_55 = arith.constant 0 : index
      %c0_56 = arith.constant 0 : index
      %89 = vector.load %arg3[%c0_53, %c1_54, %c0_55, %c0_56] : memref<1x6x8x128xf32, #tpu.memory_space<vmem>>, vector<1x1x8x128xf32>
      %90 = vector.shape_cast %89 : vector<1x1x8x128xf32> to vector<8x128xf32>
      %c0_57 = arith.constant 0 : index
      %c2_58 = arith.constant 2 : index
      %c0_59 = arith.constant 0 : index
      %c0_60 = arith.constant 0 : index
      %91 = vector.load %arg3[%c0_57, %c2_58, %c0_59, %c0_60] : memref<1x6x8x128xf32, #tpu.memory_space<vmem>>, vector<1x1x8x128xf32>
      %92 = vector.shape_cast %91 : vector<1x1x8x128xf32> to vector<8x128xf32>
      %c0_61 = arith.constant 0 : index
      %c3_62 = arith.constant 3 : index
      %c0_63 = arith.constant 0 : index
      %c0_64 = arith.constant 0 : index
      %93 = vector.load %arg3[%c0_61, %c3_62, %c0_63, %c0_64] : memref<1x6x8x128xf32, #tpu.memory_space<vmem>>, vector<1x1x8x128xf32>
      %94 = vector.shape_cast %93 : vector<1x1x8x128xf32> to vector<8x128xf32>
      %c0_65 = arith.constant 0 : index
      %c5 = arith.constant 5 : index
      %c0_66 = arith.constant 0 : index
      %c0_67 = arith.constant 0 : index
      %95 = vector.load %arg3[%c0_65, %c5, %c0_66, %c0_67] : memref<1x6x8x128xf32, #tpu.memory_space<vmem>>, vector<1x1x8x128xf32>
      %96 = vector.shape_cast %95 : vector<1x1x8x128xf32> to vector<8x128xf32>
      %cst_68 = arith.constant 5.000000e-01 : f32
      %97 = vector.broadcast %cst_68 : f32 to vector<8x128xf32>
      %98 = arith.mulf %97, %80 : vector<8x128xf32>
      %99 = math.tanh %98 : vector<8x128xf32>
      %cst_69 = arith.constant 1.000000e+00 : f32
      %100 = vector.broadcast %cst_69 : f32 to vector<8x128xf32>
      %101 = arith.addf %99, %100 : vector<8x128xf32>
      %cst_70 = arith.constant 5.000000e-01 : f32
      %102 = vector.broadcast %cst_70 : f32 to vector<8x128xf32>
      %103 = arith.mulf %102, %101 : vector<8x128xf32>
      %104 = arith.addf %103, %64 : vector<8x128xf32>
      %cst_71 = arith.constant 1.250000e-01 : f32
      %105 = vector.broadcast %cst_71 : f32 to vector<8x128xf32>
      %106 = arith.mulf %104, %105 : vector<8x128xf32>
      %cst_72 = arith.constant 5.000000e-01 : f32
      %107 = vector.broadcast %cst_72 : f32 to vector<8x128xf32>
      %108 = arith.mulf %107, %82 : vector<8x128xf32>
      %109 = math.tanh %108 : vector<8x128xf32>
      %cst_73 = arith.constant 1.000000e+00 : f32
      %110 = vector.broadcast %cst_73 : f32 to vector<8x128xf32>
      %111 = arith.addf %109, %110 : vector<8x128xf32>
      %cst_74 = arith.constant 5.000000e-01 : f32
      %112 = vector.broadcast %cst_74 : f32 to vector<8x128xf32>
      %113 = arith.mulf %112, %111 : vector<8x128xf32>
      %114 = arith.addf %113, %61 : vector<8x128xf32>
      %cst_75 = arith.constant 1.250000e-01 : f32
      %115 = vector.broadcast %cst_75 : f32 to vector<8x128xf32>
      %116 = arith.mulf %114, %115 : vector<8x128xf32>
      %117 = math.exp %84 : vector<8x128xf32>
      %118 = arith.mulf %117, %76 : vector<8x128xf32>
      %119 = math.exp %86 : vector<8x128xf32>
      %120 = arith.mulf %119, %78 : vector<8x128xf32>
      %121 = arith.addf %88, %64 : vector<8x128xf32>
      %cst_76 = arith.constant 1.250000e-01 : f32
      %122 = vector.broadcast %cst_76 : f32 to vector<8x128xf32>
      %123 = arith.mulf %121, %122 : vector<8x128xf32>
      %124 = arith.addf %90, %61 : vector<8x128xf32>
      %cst_77 = arith.constant 1.250000e-01 : f32
      %125 = vector.broadcast %cst_77 : f32 to vector<8x128xf32>
      %126 = arith.mulf %124, %125 : vector<8x128xf32>
      %127 = math.exp %92 : vector<8x128xf32>
      %128 = arith.mulf %127, %76 : vector<8x128xf32>
      %129 = math.exp %94 : vector<8x128xf32>
      %130 = arith.mulf %129, %78 : vector<8x128xf32>
      %cst_78 = arith.constant 5.000000e-01 : f32
      %131 = vector.broadcast %cst_78 : f32 to vector<8x128xf32>
      %132 = arith.mulf %131, %118 : vector<8x128xf32>
      %133 = arith.subf %106, %132 : vector<8x128xf32>
      %cst_79 = arith.constant 5.000000e-01 : f32
      %134 = vector.broadcast %cst_79 : f32 to vector<8x128xf32>
      %135 = arith.mulf %134, %118 : vector<8x128xf32>
      %136 = arith.addf %106, %135 : vector<8x128xf32>
      %cst_80 = arith.constant 5.000000e-01 : f32
      %137 = vector.broadcast %cst_80 : f32 to vector<8x128xf32>
      %138 = arith.mulf %137, %120 : vector<8x128xf32>
      %139 = arith.subf %116, %138 : vector<8x128xf32>
      %cst_81 = arith.constant 5.000000e-01 : f32
      %140 = vector.broadcast %cst_81 : f32 to vector<8x128xf32>
      %141 = arith.mulf %140, %120 : vector<8x128xf32>
      %142 = arith.addf %116, %141 : vector<8x128xf32>
      %cst_82 = arith.constant 5.000000e-01 : f32
      %143 = vector.broadcast %cst_82 : f32 to vector<8x128xf32>
      %144 = arith.mulf %143, %128 : vector<8x128xf32>
      %145 = arith.subf %123, %144 : vector<8x128xf32>
      %cst_83 = arith.constant 5.000000e-01 : f32
      %146 = vector.broadcast %cst_83 : f32 to vector<8x128xf32>
      %147 = arith.mulf %146, %128 : vector<8x128xf32>
      %148 = arith.addf %123, %147 : vector<8x128xf32>
      %cst_84 = arith.constant 5.000000e-01 : f32
      %149 = vector.broadcast %cst_84 : f32 to vector<8x128xf32>
      %150 = arith.mulf %149, %130 : vector<8x128xf32>
      %151 = arith.subf %126, %150 : vector<8x128xf32>
      %cst_85 = arith.constant 5.000000e-01 : f32
      %152 = vector.broadcast %cst_85 : f32 to vector<8x128xf32>
      %153 = arith.mulf %152, %130 : vector<8x128xf32>
      %154 = arith.addf %126, %153 : vector<8x128xf32>
      %155 = arith.minimumf %136, %148 : vector<8x128xf32>
      %156 = arith.maximumf %133, %145 : vector<8x128xf32>
      %157 = arith.subf %155, %156 : vector<8x128xf32>
      %cst_86 = arith.constant 0.000000e+00 : f32
      %158 = vector.broadcast %cst_86 : f32 to vector<8x128xf32>
      %159 = arith.maximumf %157, %158 : vector<8x128xf32>
      %160 = arith.minimumf %142, %154 : vector<8x128xf32>
      %161 = arith.maximumf %139, %151 : vector<8x128xf32>
      %162 = arith.subf %160, %161 : vector<8x128xf32>
      %cst_87 = arith.constant 0.000000e+00 : f32
      %163 = vector.broadcast %cst_87 : f32 to vector<8x128xf32>
      %164 = arith.maximumf %162, %163 : vector<8x128xf32>
      %165 = arith.mulf %159, %164 : vector<8x128xf32>
      %166 = arith.mulf %118, %120 : vector<8x128xf32>
      %cst_88 = arith.constant 1.000000e-16 : f32
      %167 = vector.broadcast %cst_88 : f32 to vector<8x128xf32>
      %168 = arith.addf %166, %167 : vector<8x128xf32>
      %169 = arith.mulf %128, %130 : vector<8x128xf32>
      %170 = arith.addf %168, %169 : vector<8x128xf32>
      %171 = arith.subf %170, %165 : vector<8x128xf32>
      %172 = arith.divf %165, %171 : vector<8x128xf32>
      %cst_89 = arith.constant 1.000000e+00 : f32
      %173 = vector.broadcast %cst_89 : f32 to vector<8x128xf32>
      %174 = arith.minimumf %172, %173 : vector<8x128xf32>
      %175 = arith.subf %123, %106 : vector<8x128xf32>
      %176 = arith.subf %123, %106 : vector<8x128xf32>
      %177 = arith.mulf %175, %176 : vector<8x128xf32>
      %178 = arith.subf %126, %116 : vector<8x128xf32>
      %179 = arith.subf %126, %116 : vector<8x128xf32>
      %180 = arith.mulf %178, %179 : vector<8x128xf32>
      %181 = arith.addf %177, %180 : vector<8x128xf32>
      %cst_90 = arith.constant 4.000000e+00 : f32
      %182 = vector.broadcast %cst_90 : f32 to vector<8x128xf32>
      %183 = arith.mulf %182, %181 : vector<8x128xf32>
      %184 = arith.mulf %128, %128 : vector<8x128xf32>
      %185 = arith.mulf %130, %130 : vector<8x128xf32>
      %186 = arith.addf %184, %185 : vector<8x128xf32>
      %cst_91 = arith.constant 1.000000e-16 : f32
      %187 = vector.broadcast %cst_91 : f32 to vector<8x128xf32>
      %188 = arith.addf %186, %187 : vector<8x128xf32>
      %189 = arith.divf %183, %188 : vector<8x128xf32>
      %cst_92 = arith.constant 1.000000e-16 : f32
      %190 = vector.broadcast %cst_92 : f32 to vector<8x128xf32>
      %191 = arith.addf %130, %190 : vector<8x128xf32>
      %192 = arith.divf %128, %191 : vector<8x128xf32>
      %cst_93 = arith.constant 1.000000e-16 : f32
      %193 = vector.broadcast %cst_93 : f32 to vector<8x128xf32>
      %194 = arith.addf %120, %193 : vector<8x128xf32>
      %195 = arith.divf %118, %194 : vector<8x128xf32>
      %cst_94 = arith.constant 1.000000e-30 : f32
      %196 = vector.broadcast %cst_94 : f32 to vector<8x128xf32>
      %197 = arith.addf %192, %196 : vector<8x128xf32>
      %cst_95 = arith.constant 1.000000e+00 : f32
      %198 = vector.broadcast %cst_95 : f32 to vector<8x128xf32>
      %199 = arith.divf %198, %197 : vector<8x128xf32>
      %cst_96 = arith.constant 1.000000e+00 : f32
      %200 = vector.broadcast %cst_96 : f32 to vector<8x128xf32>
      %201 = arith.cmpf ogt, %192, %200 : vector<8x128xf32>
      %202 = arith.select %201, %199, %192 : vector<8x128xi1>, vector<8x128xf32>
      %203 = arith.mulf %202, %202 : vector<8x128xf32>
      %cst_97 = arith.constant 0.00286622578 : f32
      %204 = vector.broadcast %cst_97 : f32 to vector<8x128xf32>
      %205 = arith.mulf %204, %203 : vector<8x128xf32>
      %cst_98 = arith.constant -0.0161657371 : f32
      %206 = vector.broadcast %cst_98 : f32 to vector<8x128xf32>
      %207 = arith.addf %205, %206 : vector<8x128xf32>
      %208 = arith.mulf %207, %203 : vector<8x128xf32>
      %cst_99 = arith.constant 0.0429096147 : f32
      %209 = vector.broadcast %cst_99 : f32 to vector<8x128xf32>
      %210 = arith.addf %208, %209 : vector<8x128xf32>
      %211 = arith.mulf %210, %203 : vector<8x128xf32>
      %cst_100 = arith.constant -0.0752896368 : f32
      %212 = vector.broadcast %cst_100 : f32 to vector<8x128xf32>
      %213 = arith.addf %211, %212 : vector<8x128xf32>
      %214 = arith.mulf %213, %203 : vector<8x128xf32>
      %cst_101 = arith.constant 0.106562637 : f32
      %215 = vector.broadcast %cst_101 : f32 to vector<8x128xf32>
      %216 = arith.addf %214, %215 : vector<8x128xf32>
      %217 = arith.mulf %216, %203 : vector<8x128xf32>
      %cst_102 = arith.constant -1.420890e-01 : f32
      %218 = vector.broadcast %cst_102 : f32 to vector<8x128xf32>
      %219 = arith.addf %217, %218 : vector<8x128xf32>
      %220 = arith.mulf %219, %203 : vector<8x128xf32>
      %cst_103 = arith.constant 0.199935511 : f32
      %221 = vector.broadcast %cst_103 : f32 to vector<8x128xf32>
      %222 = arith.addf %220, %221 : vector<8x128xf32>
      %223 = arith.mulf %222, %203 : vector<8x128xf32>
      %cst_104 = arith.constant -0.333331466 : f32
      %224 = vector.broadcast %cst_104 : f32 to vector<8x128xf32>
      %225 = arith.addf %223, %224 : vector<8x128xf32>
      %226 = arith.mulf %203, %225 : vector<8x128xf32>
      %cst_105 = arith.constant 1.000000e+00 : f32
      %227 = vector.broadcast %cst_105 : f32 to vector<8x128xf32>
      %228 = arith.addf %227, %226 : vector<8x128xf32>
      %229 = arith.mulf %202, %228 : vector<8x128xf32>
      %cst_106 = arith.constant 1.57079637 : f32
      %230 = vector.broadcast %cst_106 : f32 to vector<8x128xf32>
      %231 = arith.subf %230, %229 : vector<8x128xf32>
      %232 = arith.select %201, %231, %229 : vector<8x128xi1>, vector<8x128xf32>
      %cst_107 = arith.constant 1.000000e-30 : f32
      %233 = vector.broadcast %cst_107 : f32 to vector<8x128xf32>
      %234 = arith.addf %195, %233 : vector<8x128xf32>
      %cst_108 = arith.constant 1.000000e+00 : f32
      %235 = vector.broadcast %cst_108 : f32 to vector<8x128xf32>
      %236 = arith.divf %235, %234 : vector<8x128xf32>
      %cst_109 = arith.constant 1.000000e+00 : f32
      %237 = vector.broadcast %cst_109 : f32 to vector<8x128xf32>
      %238 = arith.cmpf ogt, %195, %237 : vector<8x128xf32>
      %239 = arith.select %238, %236, %195 : vector<8x128xi1>, vector<8x128xf32>
      %240 = arith.mulf %239, %239 : vector<8x128xf32>
      %cst_110 = arith.constant 0.00286622578 : f32
      %241 = vector.broadcast %cst_110 : f32 to vector<8x128xf32>
      %242 = arith.mulf %241, %240 : vector<8x128xf32>
      %cst_111 = arith.constant -0.0161657371 : f32
      %243 = vector.broadcast %cst_111 : f32 to vector<8x128xf32>
      %244 = arith.addf %242, %243 : vector<8x128xf32>
      %245 = arith.mulf %244, %240 : vector<8x128xf32>
      %cst_112 = arith.constant 0.0429096147 : f32
      %246 = vector.broadcast %cst_112 : f32 to vector<8x128xf32>
      %247 = arith.addf %245, %246 : vector<8x128xf32>
      %248 = arith.mulf %247, %240 : vector<8x128xf32>
      %cst_113 = arith.constant -0.0752896368 : f32
      %249 = vector.broadcast %cst_113 : f32 to vector<8x128xf32>
      %250 = arith.addf %248, %249 : vector<8x128xf32>
      %251 = arith.mulf %250, %240 : vector<8x128xf32>
      %cst_114 = arith.constant 0.106562637 : f32
      %252 = vector.broadcast %cst_114 : f32 to vector<8x128xf32>
      %253 = arith.addf %251, %252 : vector<8x128xf32>
      %254 = arith.mulf %253, %240 : vector<8x128xf32>
      %cst_115 = arith.constant -1.420890e-01 : f32
      %255 = vector.broadcast %cst_115 : f32 to vector<8x128xf32>
      %256 = arith.addf %254, %255 : vector<8x128xf32>
      %257 = arith.mulf %256, %240 : vector<8x128xf32>
      %cst_116 = arith.constant 0.199935511 : f32
      %258 = vector.broadcast %cst_116 : f32 to vector<8x128xf32>
      %259 = arith.addf %257, %258 : vector<8x128xf32>
      %260 = arith.mulf %259, %240 : vector<8x128xf32>
      %cst_117 = arith.constant -0.333331466 : f32
      %261 = vector.broadcast %cst_117 : f32 to vector<8x128xf32>
      %262 = arith.addf %260, %261 : vector<8x128xf32>
      %263 = arith.mulf %240, %262 : vector<8x128xf32>
      %cst_118 = arith.constant 1.000000e+00 : f32
      %264 = vector.broadcast %cst_118 : f32 to vector<8x128xf32>
      %265 = arith.addf %264, %263 : vector<8x128xf32>
      %266 = arith.mulf %239, %265 : vector<8x128xf32>
      %cst_119 = arith.constant 1.57079637 : f32
      %267 = vector.broadcast %cst_119 : f32 to vector<8x128xf32>
      %268 = arith.subf %267, %266 : vector<8x128xf32>
      %269 = arith.select %238, %268, %266 : vector<8x128xi1>, vector<8x128xf32>
      %270 = arith.subf %232, %269 : vector<8x128xf32>
      %cst_120 = arith.constant 0.405284733 : f32
      %271 = vector.broadcast %cst_120 : f32 to vector<8x128xf32>
      %272 = arith.mulf %271, %270 : vector<8x128xf32>
      %273 = arith.mulf %272, %270 : vector<8x128xf32>
      %cst_121 = arith.constant 1.000000e+00 : f32
      %274 = vector.broadcast %cst_121 : f32 to vector<8x128xf32>
      %275 = arith.subf %274, %174 : vector<8x128xf32>
      %276 = arith.addf %275, %273 : vector<8x128xf32>
      %cst_122 = arith.constant 1.000000e-16 : f32
      %277 = vector.broadcast %cst_122 : f32 to vector<8x128xf32>
      %278 = arith.addf %276, %277 : vector<8x128xf32>
      %cst_123 = arith.constant 9.99999971E-10 : f32
      %279 = vector.broadcast %cst_123 : f32 to vector<8x128xf32>
      %280 = arith.maximumf %278, %279 : vector<8x128xf32>
      %281 = arith.divf %273, %280 : vector<8x128xf32>
      %282 = arith.subf %174, %189 : vector<8x128xf32>
      %283 = arith.mulf %281, %273 : vector<8x128xf32>
      %284 = arith.subf %282, %283 : vector<8x128xf32>
      %cst_124 = arith.constant 1.000000e+00 : f32
      %285 = vector.broadcast %cst_124 : f32 to vector<8x128xf32>
      %286 = arith.cmpf oeq, %16, %285 : vector<8x128xf32>
      %cst_125 = arith.constant 0.000000e+00 : f32
      %287 = vector.broadcast %cst_125 : f32 to vector<8x128xf32>
      %288 = arith.subf %287, %284 : vector<8x128xf32>
      %cst_126 = arith.constant 0.000000e+00 : f32
      %289 = vector.broadcast %cst_126 : f32 to vector<8x128xf32>
      %290 = arith.select %286, %288, %289 : vector<8x128xi1>, vector<8x128xf32>
      %cst_127 = arith.constant 0.000000e+00 : f32
      %291 = vector.broadcast %cst_127 : f32 to vector<8x128xf32>
      %292 = arith.maximumf %174, %291 : vector<8x128xf32>
      %293 = arith.mulf %16, %292 : vector<8x128xf32>
      %294 = arith.mulf %14, %293 : vector<8x128xf32>
      %295 = arith.subf %18, %294 : vector<8x128xf32>
      %296 = arith.addf %295, %25 : vector<8x128xf32>
      %cst_128 = arith.constant 0.000000e+00 : f32
      %297 = vector.broadcast %cst_128 : f32 to vector<8x128xf32>
      %298 = arith.select %286, %296, %297 : vector<8x128xi1>, vector<8x128xf32>
      %c0_129 = arith.constant 0 : index
      %c5_130 = arith.constant 5 : index
      %c0_131 = arith.constant 0 : index
      %c0_132 = arith.constant 0 : index
      %299 = vector.load %arg2[%c0_129, %c5_130, %c0_131, %c0_132] : memref<1x6x8x128xf32, #tpu.memory_space<vmem>>, vector<1x1x8x128xf32>
      %300 = vector.shape_cast %299 : vector<1x1x8x128xf32> to vector<1x8x128xf32>
      %cst_133 = arith.constant 0.000000e+00 : f32
      %301 = vector.broadcast %cst_133 : f32 to vector<1x8x128xf32>
      %302 = arith.maximumf %300, %301 : vector<1x8x128xf32>
      %303 = math.absf %300 : vector<1x8x128xf32>
      %cst_134 = arith.constant 0.000000e+00 : f32
      %304 = vector.broadcast %cst_134 : f32 to vector<1x8x128xf32>
      %305 = arith.subf %304, %303 : vector<1x8x128xf32>
      %306 = math.exp %305 : vector<1x8x128xf32>
      %cst_135 = arith.constant 1.000000e+00 : f32
      %307 = vector.broadcast %cst_135 : f32 to vector<1x8x128xf32>
      %308 = arith.addf %307, %306 : vector<1x8x128xf32>
      %309 = math.log %308 : vector<1x8x128xf32>
      %310 = arith.addf %302, %309 : vector<1x8x128xf32>
      %cst_136 = arith.constant dense<0.000000e+00> : vector<8x128xf32>
      %311 = vector.multi_reduction <add>, %310, %cst_136 [0] : vector<1x8x128xf32> to vector<8x128xf32>
      %312 = arith.fptosi %96 : vector<8x128xf32> to vector<8x128xi32>
      %313 = tpu.iota {dimensions = array<i32: 0>} : vector<1x8x128xi32>
      %314 = vector.shape_cast %312 : vector<8x128xi32> to vector<1x8x128xi32>
      %315 = arith.cmpi eq, %313, %314 : vector<1x8x128xi32>
      %cst_137 = arith.constant 0.000000e+00 : f32
      %316 = vector.broadcast %cst_137 : f32 to vector<1x8x128xf32>
      %317 = arith.select %315, %300, %316 : vector<1x8x128xi1>, vector<1x8x128xf32>
      %cst_138 = arith.constant dense<0.000000e+00> : vector<8x128xf32>
      %318 = vector.multi_reduction <add>, %317, %cst_138 [0] : vector<1x8x128xf32> to vector<8x128xf32>
      %319 = arith.subf %311, %318 : vector<8x128xf32>
      %cst_139 = arith.constant 0.000000e+00 : f32
      %320 = vector.broadcast %cst_139 : f32 to vector<8x128xf32>
      %321 = arith.select %286, %319, %320 : vector<8x128xi1>, vector<8x128xf32>
      %c0_140 = arith.constant 0 : index
      %c0_141 = arith.constant 0 : index
      %c0_142 = arith.constant 0 : index
      %322 = vector.load %arg5[%c0_140, %c0_141, %c0_142] : memref<4x8x128xf32, #tpu.memory_space<vmem>>, vector<1x8x128xf32>
      %323 = vector.shape_cast %322 : vector<1x8x128xf32> to vector<8x128xf32>
      %324 = arith.addf %323, %290 : vector<8x128xf32>
      %c0_143 = arith.constant 0 : index
      %c0_144 = arith.constant 0 : index
      %c0_145 = arith.constant 0 : index
      %325 = vector.load %arg5[%c0_143, %c0_144, %c0_145] : memref<4x8x128xf32, #tpu.memory_space<vmem>>, vector<1x8x128xf32>
      %326 = vector.shape_cast %325 : vector<1x8x128xf32> to vector<8x128xf32>
      %327 = vector.shape_cast %324 : vector<8x128xf32> to vector<1x8x128xf32>
      tpu.vector_store %arg5[%c0_143, %c0_144, %c0_145], %327 {strides = array<i32>} : memref<4x8x128xf32, #tpu.memory_space<vmem>>, vector<1x8x128xf32>,
      %c1_146 = arith.constant 1 : index
      %c0_147 = arith.constant 0 : index
      %c0_148 = arith.constant 0 : index
      %328 = vector.load %arg5[%c1_146, %c0_147, %c0_148] : memref<4x8x128xf32, #tpu.memory_space<vmem>>, vector<1x8x128xf32>
      %329 = vector.shape_cast %328 : vector<1x8x128xf32> to vector<8x128xf32>
      %330 = arith.addf %329, %298 : vector<8x128xf32>
      %c1_149 = arith.constant 1 : index
      %c0_150 = arith.constant 0 : index
      %c0_151 = arith.constant 0 : index
      %331 = vector.load %arg5[%c1_149, %c0_150, %c0_151] : memref<4x8x128xf32, #tpu.memory_space<vmem>>, vector<1x8x128xf32>
      %332 = vector.shape_cast %331 : vector<1x8x128xf32> to vector<8x128xf32>
      %333 = vector.shape_cast %330 : vector<8x128xf32> to vector<1x8x128xf32>
      tpu.vector_store %arg5[%c1_149, %c0_150, %c0_151], %333 {strides = array<i32>} : memref<4x8x128xf32, #tpu.memory_space<vmem>>, vector<1x8x128xf32>,
      %c3_152 = arith.constant 3 : index
      %c0_153 = arith.constant 0 : index
      %c0_154 = arith.constant 0 : index
      %334 = vector.load %arg5[%c3_152, %c0_153, %c0_154] : memref<4x8x128xf32, #tpu.memory_space<vmem>>, vector<1x8x128xf32>
      %335 = vector.shape_cast %334 : vector<1x8x128xf32> to vector<8x128xf32>
      %336 = arith.addf %335, %321 : vector<8x128xf32>
      %c3_155 = arith.constant 3 : index
      %c0_156 = arith.constant 0 : index
      %c0_157 = arith.constant 0 : index
      %337 = vector.load %arg5[%c3_155, %c0_156, %c0_157] : memref<4x8x128xf32, #tpu.memory_space<vmem>>, vector<1x8x128xf32>
      %338 = vector.shape_cast %337 : vector<1x8x128xf32> to vector<8x128xf32>
      %339 = vector.shape_cast %336 : vector<8x128xf32> to vector<1x8x128xf32>
      tpu.vector_store %arg5[%c3_155, %c0_156, %c0_157], %339 {strides = array<i32>} : memref<4x8x128xf32, #tpu.memory_space<vmem>>, vector<1x8x128xf32>,
    } else {
    }
    %c0_i32_19 = arith.constant 0 : i32
    %45 = arith.cmpi eq, %arg1, %c0_i32_19 : i32
    %46 = arith.extui %45 : i1 to i32
    %c0_i32_20 = arith.constant 0 : i32
    %47 = arith.cmpi ne, %46, %c0_i32_20 : i32
    scf.if %47 {
      %c0_21 = arith.constant 0 : index
      %c0_22 = arith.constant 0 : index
      %c0_23 = arith.constant 0 : index
      %48 = vector.load %arg5[%c0_21, %c0_22, %c0_23] : memref<4x8x128xf32, #tpu.memory_space<vmem>>, vector<4x8x128xf32>
      %c0_24 = arith.constant 0 : index
      %c0_25 = arith.constant 0 : index
      %c0_26 = arith.constant 0 : index
      %c0_27 = arith.constant 0 : index
      %49 = vector.load %arg4[%c0_24, %c0_25, %c0_26, %c0_27] : memref<1x4x8x128xf32, #tpu.memory_space<vmem>>, vector<1x4x8x128xf32>
      %50 = vector.shape_cast %49 : vector<1x4x8x128xf32> to vector<4x8x128xf32>
      %51 = vector.shape_cast %48 : vector<4x8x128xf32> to vector<1x4x8x128xf32>
      tpu.vector_store %arg4[%c0_24, %c0_25, %c0_26, %c0_27], %51 {strides = array<i32>} : memref<1x4x8x128xf32, #tpu.memory_space<vmem>>, vector<1x4x8x128xf32>,
    } else {
    }
    return
  }
  func.func @transform_0(%arg0: i32, %arg1: i32) -> (i32, i32, i32, i32) {
    %c0_i32 = arith.constant 0 : i32
    %c0_i32_0 = arith.constant 0 : i32
    %c0_i32_1 = arith.constant 0 : i32
    return %arg0, %c0_i32, %arg1, %c0_i32_0 : i32, i32, i32, i32
  }
  func.func @transform_1(%arg0: i32, %arg1: i32) -> (i32, i32, i32, i32) {
    %c0_i32 = arith.constant 0 : i32
    %c0_i32_0 = arith.constant 0 : i32
    %c0_i32_1 = arith.constant 0 : i32
    return %arg0, %c0_i32, %arg1, %c0_i32_0 : i32, i32, i32, i32
  }
  func.func @transform_2(%arg0: i32, %arg1: i32) -> (i32, i32, i32, i32) {
    %c0_i32 = arith.constant 0 : i32
    %c0_i32_0 = arith.constant 0 : i32
    %c0_i32_1 = arith.constant 0 : i32
    %c0_i32_2 = arith.constant 0 : i32
    return %arg0, %c0_i32, %c0_i32_0, %c0_i32_1 : i32, i32, i32, i32
  }
}

</mosaic_0001>

<bundles_post_ra>
// kernel: fn.1
= control target key start
LH: loop header
LB: loop body
LE: loop exit
PB: predicated region body
PF: predicated region fallthrough
CT: control target
= control target key end

     0   :  { %s685_s9 = smov 0   ;;  %s687_s10 = smov 0   ;;  %s804_s0 = inlined_call_operand.vmem [shape: f32[2,6,8,128], index: 0, kind: input, shape index: {}]   ;;  %s805_s1 = inlined_call_operand.vmem [shape: f32[2,6,8,128], index: 1, kind: input, shape index: {}]   ;;  %s806_s2 = inlined_call_operand.vmem [shape: f32[2,4,8,128], index: 2, kind: output, shape index: {}]  }
   0x1   :  { %s689_s11 = smov 0  }
   0x2 LB: > { %s24_s12 = sadd.s32 1, %s661_s10  ;;  %p559_p0 = scmp.ge.s32.totalorder %s665_s11, 1  ;;  %s665_s11 = sphi %s689_s11, %s12_s11   ;;  %s661_s10 = sphi %s687_s10, %s808_s10   ;;  %s657_s9 = sphi %s685_s9, %s807_s9  }
   0x3   : > { %p26_p1 = scmp.ge.s32.totalorder %s24_s12, 2  ;;  %p144_p2 = scmp.lt.s32.totalorder %s665_s11, 3 }
   0x5   : > { %s810_s12 = smov (%p26_p1, %s24_s12), 0  ;;  %p145_p3 = pnand %p559_p0, %p144_p2 }
   0x6   : > { %p177_p4 = scmp.lt.s32.totalorder (!%p145_p3), %s657_s9, 1  ;;  %v667_v0 = vmov (!%p145_p3), 0.0   ;;  %v206_v6 = vlaneseq (!%p145_p3) }
   0x7   : > { %148 = sbr.rel (%p145_p3) target bundleno = 364 (0x16c), region = 28  ;;  %202 = vst [vmem:[#allocation2] sm:$0xff] (!%p145_p3), %v667_v0  ;;  %203 = vst [vmem:[#allocation2 + $0x8] sm:$0xff] (!%p145_p3), %v667_v0 }
   0x8   : > { %205 = vst [vmem:[#allocation2 + $0x18] sm:$0xff] (!%p145_p3), %v667_v0  ;;  %v207_v8 = vshrl.u32 (!%p145_p3), %v206_v6, 7  ;;  %v209_v10 = vand.u32 (!%p145_p3), 127, %v206_v6 }
   0xa   : > { %v211_v11 = vmul.u32 (!%p145_p3), 128, %v207_v8 }
   0xc   : > { %v214_v12 = vadd.s32 (!%p145_p3), %v211_v11, %v209_v10 }
   0xe   : > { %s812_s9 = smov (!%p177_p4, %s657_s9), 1  ;;  %vm215_vm0 = vcmp.lt.s32.totalorder %v214_v12, 192 }
   0xf   : > { %s577_s13 = smul.u32 48, %s812_s9  ;;  %s576_s14 = sshll.u32 %s812_s9, 5 }
  0x10   : > { %s706_s17 = scalar_lea.vmem %s806_s2, %s576_s14 }
  0x11   : > { %s711_s20 = scalar_lea.vmem %s804_s0, %s577_s13  ;;  %s716_s23 = scalar_lea.vmem %s805_s1, %s577_s13 }
  0x12   : > { %v719_v1 = vld [vmem:[%s711_s20 + $0x20] sm:$0xff] }
  0x13   : > { %v722_v2 = vld [vmem:[%s716_s23 + $0x20] sm:$0xff]  ;;  %v221_v3 = vand.u32 2147483647, %v719_v1  ;;  %v220_v13 = vmax.f32 %v719_v1, 0.0 }
  0x14   : > { %236 = vmax.xlane.f32.xlu0 %v722_v2  ;;  %vm228_vm1 = vcmp.eq.f32.partialorder %v722_v2, 0.0 }
  0x15   : > { %v222_v4 = vsub.f32 0.0, %v221_v3  ;;  %vm229_vm2 = vmand %vm228_vm1, %vm215_vm0 }
  0x17   : > { %v223_v5 = vmul.f32 1.442695, %v222_v4 }
  0x19   : > { %609 = vpow2.f32 %v223_v5 }
  0x23   : > { %v610_v7 = vpop.eup %609 }
  0x24   : > { %v225_v9 = vadd.f32 1.0, %v610_v7 }
  0x26   : > { %611 = vlog2.f32 %v225_v9 }
  0x30   : > { %v612_v14 = vpop.eup %611 }
  0x31   : > { %v728_v15 = vmul.f32 0.6931472, %v612_v14 }
  0x33   : > { %v232_v16 = vadd.f32 %v728_v15, %v220_v13 }
  0x35   : > { %v233_v17 = vsel %vm229_vm2, %v232_v16, 0.0 }
  0x36   : > { %235 = vst [vmem:[#allocation2 + $0x10] sm:$0xff] %v233_v17 }
  0xa1   : > { %v237_v18 = vpop.xlane.xlu0 %236 }
  0xa2   : > { %v238_v19 = vrot.slane %v237_v18, 4 }
  0xa4   : > { %v239_v20 = vmax.f32 %v237_v18, %v238_v19 }
  0xa6   : > { %v240_v21 = vrot.slane %v239_v20, 2 }
  0xa8   : > { %v241_v22 = vmax.f32 %v239_v20, %v240_v21 }
  0xaa   : > { %v242_v23 = vrot.slane %v241_v22, 1 }
  0xac   : > { %v243_v24 = vmax.f32 %v241_v22, %v242_v23 }
  0xae   : > { %578 = vpush %v243_v24 }
  0xdf   : > { %s579_s24 = spop %578 }
  0xe0   : > { %p245_p5 = scmp.gt.f32.partialorder %s579_s24, 0.5 }
  0xe1   : > { %v249_v25 = vcvt.s32.f32 (%p245_p5), %v214_v12  ;;  %v266_v26 = vld [vmem:[%s711_s20] sm:$0xff] (%p245_p5)  ;;  %v566_v27 = vld [vmem:[%s711_s20 + $0x8] sm:$0xff] (%p245_p5)  ;;  %v567_v28 = vld [vmem:[%s711_s20 + $0x10] sm:$0xff] (%p245_p5)  ;;  %v668_v46 = vmov (%p245_p5), 11.0   ;;  %v669_v48 = vmov (%p245_p5), 13.0   ;;  %vm419_vm6 = vcmp.eq.f32.partialorder (%p245_p5), %v722_v2, 1.0 }
  0xe2   : > { %248 = sbr.rel (!%p245_p5) target bundleno = 356 (0x164), region = 36  ;;  %v568_v29 = vld [vmem:[%s711_s20 + $0x18] sm:$0xff] (%p245_p5)  ;;  %v282_v30 = vmul.f32 (%p245_p5), 0.5, %v266_v26  ;;  %v288_v31 = vmul.f32 (%p245_p5), 0.5, %v566_v27  ;;  %v570_v33 = vld [vmem:[%s716_s23 + $0x10] sm:$0xff] (%p245_p5)  ;;  %v740_v40 = vld [vmem:[%s711_s20 + $0x28] sm:$0xff] (%p245_p5) }
  0xe3   : > { %v250_v32 = vadd.f32 (%p245_p5), 0.5, %v249_v25  ;;  %v571_v34 = vld [vmem:[%s716_s23 + $0x18] sm:$0xff] (%p245_p5)  ;;  %v294_v35 = vmul.f32 (%p245_p5), 1.442695, %v567_v28  ;;  %v297_v36 = vmul.f32 (%p245_p5), 1.442695, %v568_v29 }
  0xe4   : > { %613 = vtanh.f32 (%p245_p5), %v282_v30  ;;  %v304_v37 = vmul.f32 (%p245_p5), 1.442695, %v570_v33  ;;  %v307_v39 = vmul.f32 (%p245_p5), 1.442695, %v571_v34  ;;  %v431_v41 = vand.u32 (%p245_p5), 2147483647, %v740_v40 }
  0xe5   : > { %v251_v38 = vmul.f32 (%p245_p5), 0.015625, %v250_v32  ;;  %615 = vtanh.f32 (%p245_p5), %v288_v31  ;;  %v569_v59 = vld [vmem:[%s716_s23 + $0x8] sm:$0xff] (%p245_p5)  ;;  %v273_v10 = vld [vmem:[%s716_s23] sm:$0xff] (%p245_p5) }
  0xe6   : > { %617 = vpow2.f32 (%p245_p5), %v294_v35  ;;  %v432_v43 = vsub.f32 (%p245_p5), 0.0, %v431_v41 }
  0xe7   : > { %v252_v42 = vfloor.f32 (%p245_p5), %v251_v38  ;;  %619 = vpow2.f32 (%p245_p5), %v297_v36 }
  0xe8   : > { %621 = vpow2.f32 (%p245_p5), %v304_v37  ;;  %v433_v50 = vmul.f32 (%p245_p5), 1.442695, %v432_v43 }
  0xe9   : > { %v253_v44 = vmul.f32 64.0, %v252_v42  ;;  %vm260_vm3 = vcmp.lt.f32.partialorder %v252_v42, 1.5  ;;  %623 = vpow2.f32 %v307_v39  ;;  %vm263_vm4 = vcmp.lt.f32.partialorder %v252_v42, 0.5 }
  0xea   : > { %v261_v47 = vsel %vm260_vm3, 7.0, %v668_v46  ;;  %v262_v49 = vsel %vm260_vm3, 9.0, %v669_v48  ;;  %625 = vpow2.f32 %v433_v50 }
  0xeb   : > { %v254_v45 = vsub.f32 %v249_v25, %v253_v44  ;;  %v264_v55 = vsel %vm263_vm4, 4.0, %v261_v47  ;;  %v265_v56 = vsel %vm263_vm4, 6.0, %v262_v49 }
  0xed   : > { %v255_v51 = vadd.f32 0.5, %v254_v45 }
  0xee   : > { %v614_v52 = vpop.eup %613 }
  0xef   : > { %v616_v53 = vpop.eup %615  ;;  %v256_v54 = vmul.f32 0.125, %v255_v51  ;;  %v284_v57 = vadd.f32 1.0, %v614_v52 }
  0xf0   : > { %v618_v58 = vpop.eup %617  ;;  %v290_v60 = vadd.f32 1.0, %v616_v53 }
  0xf1   : > { %v620_v61 = vpop.eup %619  ;;  %v257_v62 = vfloor.f32 %v256_v54  ;;  %v744_v3 = vmul.f32 %v618_v58, %v264_v55  ;;  %v285_v7 = vmul.f32 0.5, %v284_v57  ;;  %v572_v54 = vld [vmem:[%s716_s23 + $0x28] sm:$0xff] }
  0xf2   : > { %v622_v63 = vpop.eup %621  ;;  %v291_v0 = vmul.f32 0.5, %v290_v60  ;;  %v299_v4 = vmul.f32 %v620_v61, %v265_v56  ;;  %v580_v61 = vtrunc.f32 %v572_v54 }
  0xf3   : > { %v624_v5 = vpop.eup %623  ;;  %v258_v6 = vmul.f32 8.0, %v257_v62  ;;  %v302_v8 = vadd.f32 %v569_v59, %v257_v62  ;;  %v306_v9 = vmul.f32 %v622_v63, %v264_v55  ;;  %v310_v19 = vmul.f32 0.5, %v744_v3 }
  0xf4   : > { %v292_v11 = vadd.f32 %v291_v0, %v257_v62  ;;  %v309_v12 = vmul.f32 %v624_v5, %v265_v56  ;;  %v313_v14 = vmul.f32 0.5, %v299_v4  ;;  %v331_v16 = vmul.f32 %v299_v4, %v744_v3  ;;  %v626_v37 = vpop.eup %625 }
  0xf5   : > { %v259_v17 = vsub.f32 %v254_v45, %v258_v6  ;;  %v303_v18 = vmul.f32 0.125, %v302_v8  ;;  %v316_v20 = vmul.f32 0.5, %v306_v9  ;;  %v345_v24 = vmul.f32 %v306_v9, %v306_v9 }
  0xf6   : > { %v293_v21 = vmul.f32 0.125, %v292_v11  ;;  %v319_v22 = vmul.f32 0.5, %v309_v12  ;;  %v332_v23 = vadd.f32 1e-16, %v331_v16  ;;  %v346_v27 = vmul.f32 %v309_v12, %v309_v12 }
  0xf7   : > { %v286_v25 = vadd.f32 %v285_v7, %v259_v17  ;;  %v300_v26 = vadd.f32 %v273_v10, %v259_v17  ;;  %v351_v28 = vadd.f32 1e-16, %v309_v12  ;;  %v333_v35 = vmul.f32 %v309_v12, %v306_v9 }
  0xf8   : > { %v314_v29 = vsub.f32 %v293_v21, %v313_v14  ;;  %v315_v30 = vadd.f32 %v313_v14, %v293_v21  ;;  %v320_v31 = vsub.f32 %v303_v18, %v319_v22  ;;  %v321_v32 = vadd.f32 %v319_v22, %v303_v18 }
  0xf9   : > { %v287_v33 = vmul.f32 0.125, %v286_v25  ;;  %v301_v34 = vmul.f32 0.125, %v300_v26  ;;  %v341_v36 = vsub.f32 %v303_v18, %v293_v21  ;;  %v347_v41 = vadd.f32 %v346_v27, %v345_v24  ;;  %v454_v21 = vld [vmem:[#allocation2 + $0x18] sm:$0xff] }
  0xfa   : > { %v326_v38 = vmin.f32 %v315_v30, %v321_v32  ;;  %v327_v39 = vmax.f32 %v314_v29, %v320_v31  ;;  %627 = vrcp.f32 %v351_v28  ;;  %v354_v52 = vadd.f32 1e-16, %v299_v4 }
  0xfb   : > { %v311_v42 = vsub.f32 %v287_v33, %v310_v19  ;;  %v312_v43 = vadd.f32 %v310_v19, %v287_v33  ;;  %v317_v44 = vsub.f32 %v301_v34, %v316_v20  ;;  %v318_v45 = vadd.f32 %v316_v20, %v301_v34 }
  0xfc   : > { %v328_v46 = vsub.f32 %v326_v38, %v327_v39  ;;  %v339_v47 = vsub.f32 %v301_v34, %v287_v33  ;;  %v342_v48 = vmul.f32 %v341_v36, %v341_v36  ;;  %v348_v49 = vadd.f32 1e-16, %v347_v41 }
  0xfd   : > { %v322_v50 = vmin.f32 %v312_v43, %v318_v45  ;;  %v323_v51 = vmax.f32 %v311_v42, %v317_v44  ;;  %v435_v53 = vadd.f32 1.0, %v626_v37  ;;  %v334_v60 = vadd.f32 %v333_v35, %v332_v23  ;;  %v450_v44 = vld [vmem:[#allocation2 + $0x8] sm:$0xff] }
  0xfe   : > { %v340_v55 = vmul.f32 %v339_v47, %v339_v47  ;;  %629 = vrcp.f32 %v348_v49  ;;  %v329_v57 = vmax.f32 %v328_v46, 0.0  ;;  %v581_v7 = vcvt.f32.s32 %v580_v61 }
  0xff   : > { %v324_v56 = vsub.f32 %v322_v50, %v323_v51  ;;  %631 = vrcp.f32 %v354_v52  ;;  %v430_v12 = vmax.f32 %v740_v40, 0.0 }
 0x100   : > { %v343_v58 = vadd.f32 %v342_v48, %v340_v55  ;;  %633 = vlog2.f32 %v435_v53  ;;  %vm441_vm5 = vcmp.eq.s32.totalorder %v581_v7, 0 }
 0x101   : > { %v325_v59 = vmax.f32 %v324_v56, 0.0  ;;  %v442_v18 = vsel %vm441_vm5, %v740_v40, 0.0 }
 0x102   : > { %v344_v5 = vmul.f32 4.0, %v343_v58 }
 0x103   : > { %v330_v62 = vmul.f32 %v329_v57, %v325_v59 }
 0x104   : > { %v628_v63 = vpop.eup %627 }
 0x105   : > { %v335_v0 = vsub.f32 %v334_v60, %v330_v62  ;;  %v750_v6 = vmul.f32 %v628_v63, %v306_v9 }
 0x107   : > { %635 = vrcp.f32 %v335_v0  ;;  %v357_v4 = vadd.f32 1e-30, %v750_v6  ;;  %vm360_vm7 = vcmp.gt.f32.partialorder %v750_v6, 1.0 }
 0x108   : > { %v630_v8 = vpop.eup %629 }
 0x109   : > { %v632_v10 = vpop.eup %631  ;;  %v753_v11 = vmul.f32 %v630_v8, %v344_v5  ;;  %637 = vrcp.f32 %v357_v4 }
 0x10a   : > { %v634_v14 = vpop.eup %633  ;;  %v757_v16 = vmul.f32 %v632_v10, %v744_v3 }
 0x10b   : > { %v437_v17 = vmul.f32 0.6931472, %v634_v14 }
 0x10c   : > { %v382_v9 = vadd.f32 1e-30, %v757_v16  ;;  %vm385_vm8 = vcmp.gt.f32.partialorder %v757_v16, 1.0 }
 0x10d   : > { %v438_v19 = vadd.f32 %v437_v17, %v430_v12 }
 0x10e   : > { %639 = vrcp.f32 %v382_v9 }
 0x10f   : > { %v444_v20 = vsub.f32 %v438_v19, %v442_v18 }
 0x111   : > { %v636_v22 = vpop.eup %635  ;;  %v445_v23 = vsel %vm419_vm6, %v444_v20, 0.0 }
 0x112   : > { %v337_v24 = vmul.f32 %v636_v22, %v330_v62  ;;  %v455_v3 = vadd.f32 %v454_v21, %v445_v23 }
 0x113   : > { %v638_v25 = vpop.eup %637 }
 0x114   : > { %v765_v26 = vmin.f32 %v337_v24, 1.0  ;;  %v361_v40 = vsel %vm360_vm7, %v638_v25, %v750_v6  ;;  %456 = vst [vmem:[#allocation2 + $0x18] sm:$0xff] %v455_v3  ;;  %v446_v6 = vld [vmem:[#allocation2] sm:$0xff] }
 0x115   : > { %v362_v27 = vmul.f32 %v361_v40, %v361_v40 }
 0x116   : > { %v416_v28 = vsub.f32 %v765_v26, %v753_v11  ;;  %v422_v29 = vmax.f32 %v765_v26, 0.0  ;;  %v410_v21 = vsub.f32 1.0, %v765_v26 }
 0x117   : > { %v363_v30 = vmul.f32 0.0028662258, %v362_v27 }
 0x118   : > { %v640_v31 = vpop.eup %639  ;;  %v423_v32 = vmul.f32 %v722_v2, %v422_v29 }
 0x119   : > { %v364_v33 = vadd.f32 -0.016165737, %v363_v30  ;;  %v386_v34 = vsel %vm385_vm8, %v640_v31, %v757_v16 }
 0x11a   : > { %v387_v35 = vmul.f32 %v386_v34, %v386_v34  ;;  %v424_v36 = vmul.f32 %v719_v1, %v423_v32 }
 0x11b   : > { %v365_v37 = vmul.f32 %v364_v33, %v362_v27 }
 0x11c   : > { %v388_v38 = vmul.f32 0.0028662258, %v387_v35  ;;  %v425_v39 = vsub.f32 %v220_v13, %v424_v36 }
 0x11d   : > { %v366_v41 = vadd.f32 0.042909615, %v365_v37 }
 0x11e   : > { %v389_v42 = vadd.f32 -0.016165737, %v388_v38  ;;  %v426_v43 = vadd.f32 %v425_v39, %v728_v15 }
 0x11f   : > { %v367_v45 = vmul.f32 %v366_v41, %v362_v27 }
 0x120   : > { %v390_v46 = vmul.f32 %v389_v42, %v387_v35  ;;  %v427_v47 = vsel %vm419_vm6, %v426_v43, 0.0 }
 0x121   : > { %v368_v48 = vadd.f32 -0.07528964, %v367_v45  ;;  %v451_v49 = vadd.f32 %v450_v44, %v427_v47 }
 0x122   : > { %v391_v50 = vadd.f32 0.042909615, %v390_v46 }
 0x123   : > { %v369_v51 = vmul.f32 %v368_v48, %v362_v27  ;;  %452 = vst [vmem:[#allocation2 + $0x8] sm:$0xff] %v451_v49 }
 0x124   : > { %v392_v52 = vmul.f32 %v391_v50, %v387_v35 }
 0x125   : > { %v370_v53 = vadd.f32 0.10656264, %v369_v51 }
 0x126   : > { %v393_v54 = vadd.f32 -0.07528964, %v392_v52 }
 0x127   : > { %v371_v1 = vmul.f32 %v370_v53, %v362_v27 }
 0x128   : > { %v394_v13 = vmul.f32 %v393_v54, %v387_v35 }
 0x129   : > { %v372_v55 = vadd.f32 -0.142089, %v371_v1 }
 0x12a   : > { %v395_v56 = vadd.f32 0.10656264, %v394_v13 }
 0x12b   : > { %v373_v57 = vmul.f32 %v372_v55, %v362_v27 }
 0x12c   : > { %v396_v15 = vmul.f32 %v395_v56, %v387_v35 }
 0x12d   : > { %v374_v58 = vadd.f32 0.19993551, %v373_v57 }
 0x12e   : > { %v397_v59 = vadd.f32 -0.142089, %v396_v15 }
 0x12f   : > { %v375_v60 = vmul.f32 %v374_v58, %v362_v27 }
 0x130   : > { %v398_v61 = vmul.f32 %v397_v59, %v387_v35 }
 0x131   : > { %v376_v62 = vadd.f32 -0.33333147, %v375_v60 }
 0x132   : > { %v399_v63 = vadd.f32 0.19993551, %v398_v61 }
 0x133   : > { %v377_v0 = vmul.f32 %v376_v62, %v362_v27 }
 0x134   : > { %v400_v5 = vmul.f32 %v399_v63, %v387_v35 }
 0x135   : > { %v378_v7 = vadd.f32 1.0, %v377_v0 }
 0x136   : > { %v401_v4 = vadd.f32 -0.33333147, %v400_v5 }
 0x137   : > { %v379_v8 = vmul.f32 %v378_v7, %v361_v40 }
 0x138   : > { %v402_v10 = vmul.f32 %v401_v4, %v387_v35 }
 0x139   : > { %v380_v11 = vsub.f32 1.5707964, %v379_v8 }
 0x13a   : > { %v403_v12 = vadd.f32 1.0, %v402_v10 }
 0x13b   : > { %v381_v17 = vsel %vm360_vm7, %v380_v11, %v379_v8 }
 0x13c   : > { %v404_v14 = vmul.f32 %v403_v12, %v386_v34 }
 0x13e   : > { %v405_v9 = vsub.f32 1.5707964, %v404_v14 }
 0x140   : > { %v406_v18 = vsel %vm385_vm8, %v405_v9, %v404_v14 }
 0x141   : > { %v407_v19 = vsub.f32 %v381_v17, %v406_v18 }
 0x143   : > { %v408_v20 = vmul.f32 0.40528473, %v407_v19 }
 0x145   : > { %v409_v22 = vmul.f32 %v408_v20, %v407_v19 }
 0x147   : > { %v411_v23 = vadd.f32 %v410_v21, %v409_v22 }
 0x149   : > { %v412_v24 = vadd.f32 1e-16, %v411_v23 }
 0x14b   : > { %v413_v3 = vmax.f32 %v412_v24, 1e-09 }
 0x14d   : > { %641 = vrcp.f32 %v413_v3 }
 0x157   : > { %v642_v25 = vpop.eup %641 }
 0x158   : > { %v415_v40 = vmul.f32 %v642_v25, %v409_v22 }
 0x15a   : > { %v417_v27 = vmul.f32 %v415_v40, %v409_v22 }
 0x15c   : > { %v418_v29 = vsub.f32 %v416_v28, %v417_v27 }
 0x15e   : > { %v420_v30 = vsub.f32 0.0, %v418_v29 }
 0x160   : > { %v421_v31 = vsel %vm419_vm6, %v420_v30, 0.0 }
 0x161   : > { %v447_v16 = vadd.f32 %v446_v6, %v421_v31 }
 0x163   : > { %448 = vst [vmem:[#allocation2] sm:$0xff] %v447_v16 }
 0x164 PF: > { %v461_v26 = vld [vmem:[#allocation2 + $0x8] sm:$0xff]  ;;  %v462_v33 = vld [vmem:[#allocation2 + $0x10] sm:$0xff]  ;;  %v463_v34 = vld [vmem:[#allocation2 + $0x18] sm:$0xff] }
 0x165   : > { %465 = vst [vmem:[%s706_s17 + $0x8] sm:$0xff] %v461_v26  ;;  %466 = vst [vmem:[%s706_s17 + $0x10] sm:$0xff] %v462_v33 }
 0x166   : > { %467 = vst [vmem:[%s706_s17 + $0x18] sm:$0xff] %v463_v34 }
 0x16a   : > { %v460_v32 = vld [vmem:[#allocation2] sm:$0xff] }
 0x16b   : > { %464 = vst [vmem:[%s706_s17] sm:$0xff] %v460_v32 }
 0x16c PF: > { %s12_s11 = sadd.s32 1, %s665_s11   ;;  %s807_s9 = smov %s661_s10 }
 0x16d   : > { %p9_p6 = scmp.ge.s32.totalorder %s12_s11, 4   ;;  %s808_s10 = smov %s810_s12 }
 0x16f   :  { %11 = sbr.rel (!%p9_p6) target bundleno = 2 (0x2), region = 86 }

</bundles_post_ra>
